<compile_context>
chip_gen: v7x
topology: tpu7x:2x2x1
jax: 0.10.0
libtpu: 0.0.40
codegen_flags: <defaults>
</compile_context>

<pallas_src>
import jax
import jax.numpy as jnp
import numpy as np
from jax.experimental import pallas as pl
from jax.experimental.pallas import tpu as pltpu


def _round_up(x, m):
    return ((x + m - 1) // m) * m


def gin_kernel(a_ref, x_ref, w1_ref, b1_ref, w2_ref, b2_ref, wc_ref, bc_ref,
               out_ref, bd_ref):
    # a_ref : (Bt, N, N)    A_hat = mean-normalized adjacency + I (compute dtype)
    # x_ref : (Bt*N, Fin)   node features flattened over the graph tile
    # w*    : (in, out_p)   transposed weights, out dim lane-padded to 128
    # b*    : (1, out_p)    biases (f32, added after f32 accumulation)
    # out   : (Bt, Cp)      lane-dense logits block (f32)
    # bd_ref: (Bt*N, Bt*N)  scratch: block-diagonal aggregation matrix
    bt, n, _ = a_ref.shape
    fin = x_ref.shape[-1]
    hp = w1_ref.shape[1]
    cdt = bd_ref.dtype  # compute dtype for MXU operands (bf16 or f32)

    # Scatter per-graph adjacency blocks onto the diagonal of one big matrix so
    # each aggregation is a single dense MXU matmul instead of Bt tiny K=N ones.
    bd_ref[...] = jnp.zeros_like(bd_ref)
    for i in range(bt):  # static unroll, static slices
        bd_ref[i * n:(i + 1) * n, i * n:(i + 1) * n] = a_ref[i]
    bd = bd_ref[...]

    x = x_ref[...]  # (Bt*N, Fin)

    # ---- GINConv layer 1: h1 = relu(((A + I) @ x) @ W1 + b1) ----
    agg1 = jnp.dot(bd, x, preferred_element_type=jnp.float32)          # (Bt*N, Fin)
    z1 = jnp.dot(agg1.astype(cdt), w1_ref[...],
                 preferred_element_type=jnp.float32) + b1_ref[...]
    h1 = jnp.maximum(z1, 0.0)                                          # (Bt*N, Hp) f32

    # ---- GINConv layer 2: h2 = ((A + I) @ h1) @ W2 + b2 ----
    agg2 = jnp.dot(bd, h1.astype(cdt), preferred_element_type=jnp.float32)
    h2 = jnp.dot(agg2.astype(cdt), w2_ref[...],
                 preferred_element_type=jnp.float32) + b2_ref[...]     # (Bt*N, Hp)

    # ---- max-node readout + classifier (batched over the graph tile) ----
    hg = jnp.max(h2.reshape(bt, n, hp), axis=1)                        # (Bt, Hp)
    out_ref[...] = jnp.dot(hg.astype(cdt), wc_ref[...],
                           preferred_element_type=jnp.float32) + bc_ref[...]


def gin_forward(adj_mean, x, w1, b1, w2, b2, wc, bc, *, block_graphs=None,
                compute_dtype=jnp.bfloat16, min_grid=2,
                vmem_budget_bytes=12 * 1024 * 1024):
    """adj_mean: (B, N, N) f32 mean-normalized adjacency (zero diagonal);
    x: (B, N, Fin) f32; w1: (Fin, H), w2: (H, H), wc: (H, C) (already transposed);
    biases (1, dim). compute_dtype is the MXU operand dtype (accumulation is f32)."""
    B, N, Fin = x.shape
    H = w1.shape[1]
    C = wc.shape[1]
    assert N % 8 == 0, "nodes per graph must be a multiple of 8 (sublane tiling)"

    Hp = _round_up(H, 128)
    Cp = _round_up(C, 128)
    act_bytes = jnp.dtype(compute_dtype).itemsize

    # Fold the self term into the adjacency: (x + A@x) == (A + I)@x exactly
    # (the DGL graphs have no self loops, so diag(A) == 0).
    a_hat = (adj_mean + jnp.eye(N, dtype=adj_mean.dtype)).astype(compute_dtype)

    # Flatten node features over the batch; keep the TRUE Fin (no lane padding —
    # the MXU pads the contraction dim internally for free).
    x_flat = x.reshape(B * N, Fin).astype(compute_dtype)

    # Only the OUTPUT dims of the weights are lane-padded to 128; padded columns
    # stay exactly zero through relu, the max readout and the classifier.
    w1_p = jnp.pad(w1, ((0, 0), (0, Hp - H))).astype(compute_dtype)
    b1_p = jnp.pad(b1, ((0, 0), (0, Hp - H))).astype(jnp.float32)
    w2_p = jnp.pad(w2, ((0, Hp - H), (0, Hp - H))).astype(compute_dtype)
    b2_p = jnp.pad(b2, ((0, 0), (0, Hp - H))).astype(jnp.float32)
    wc_p = jnp.pad(wc, ((0, Hp - H), (0, Cp - C))).astype(compute_dtype)
    bc_p = jnp.pad(bc, ((0, 0), (0, Cp - C))).astype(jnp.float32)

    def fits_vmem(bt):
        rows = bt * N
        stream = 2 * (bt * N * N * act_bytes + rows * Fin * act_bytes + bt * Cp * 4)
        weights = 2 * ((Fin * Hp + Hp * Hp + Hp * Cp) * act_bytes + 3 * Hp * 4)
        scratch = rows * rows * act_bytes
        interm = 4 * rows * Hp * 4  # live f32 intermediates (agg/z/h1/h2), rough
        return stream + weights + scratch + interm <= vmem_budget_bytes

    # Largest admissible graph tile: amortizes the per-grid-step overhead while
    # keeping >= min_grid steps (pipeline overlap / megacore) and fitting VMEM.
    if block_graphs is None:
        divisors = [d for d in range(1, B + 1) if B % d == 0]
        good = [d for d in divisors if (B // d) >= min_grid and fits_vmem(d)]
        if not good:
            good = [d for d in divisors if fits_vmem(d)] or [1]
        block_graphs = max(good)
    Bt = block_graphs
    assert B % Bt == 0

    full = lambda arr: pl.BlockSpec(arr.shape, lambda g: (0,) * arr.ndim)

    out = pl.pallas_call(
        gin_kernel,
        out_shape=jax.ShapeDtypeStruct((B, Cp), jnp.float32),
        grid_spec=pltpu.PrefetchScalarGridSpec(
            num_scalar_prefetch=0,
            grid=(B // Bt,),
            in_specs=[
                pl.BlockSpec((Bt, N, N), lambda g: (g, 0, 0)),       # A_hat tile
                pl.BlockSpec((Bt * N, Fin), lambda g: (g, 0)),       # feature tile
                full(w1_p), full(b1_p),
                full(w2_p), full(b2_p),
                full(wc_p), full(bc_p),
            ],
            out_specs=pl.BlockSpec((Bt, Cp), lambda g: (g, 0)),
            scratch_shapes=[pltpu.VMEM((Bt * N, Bt * N), compute_dtype)],
        ),
        compiler_params=pltpu.CompilerParams(dimension_semantics=("parallel",)),
    )(a_hat, x_flat, w1_p, b1_p, w2_p, b2_p, wc_p, bc_p)
    return out[:, :C]  # strip the lane padding of the class dim


def reference_forward(adj_mean, x, w1, b1, w2, b2, wc, bc):
    agg1 = jnp.einsum("bij,bjf->bif", adj_mean, x)
    h1 = jax.nn.relu(jnp.einsum("bnf,fh->bnh", x + agg1, w1) + b1)
    agg2 = jnp.einsum("bij,bjf->bif", adj_mean, h1)
    h2 = jnp.einsum("bnf,fh->bnh", h1 + agg2, w2) + b2
    hg = jnp.max(h2, axis=1)
    return hg @ wc + bc


if __name__ == "__main__":
    key = jax.random.PRNGKey(0)
    B, N = 16, 16          # graphs in batch, nodes per graph
    in_feats, hidden_feats, num_classes = 16, 32, 8

    k_adj, k_x, k_w1, k_b1, k_w2, k_b2, k_wc, k_bc = jax.random.split(key, 8)

    # Random directed adjacency per graph, then mean-normalize rows (in-neighbors).
    adj_raw = (jax.random.uniform(k_adj, (B, N, N)) < 0.3).astype(jnp.float32)
    adj_raw = adj_raw * (1.0 - jnp.eye(N))          # no self loops (DGL edges only)
    in_deg = jnp.sum(adj_raw, axis=-1, keepdims=True)
    adj_mean = adj_raw / jnp.maximum(in_deg, 1.0)   # 0-in-degree rows -> zeros

    x = jax.random.normal(k_x, (B, N, in_feats), dtype=jnp.float32)

    def init_linear(kw, kb, fan_in, fan_out):
        bound = 1.0 / np.sqrt(fan_in)
        w = jax.random.uniform(kw, (fan_in, fan_out), minval=-bound, maxval=bound,
                               dtype=jnp.float32)
        b = jax.random.uniform(kb, (1, fan_out), minval=-bound, maxval=bound,
                               dtype=jnp.float32)
        return w, b

    w1, b1 = init_linear(k_w1, k_b1, in_feats, hidden_feats)
    w2, b2 = init_linear(k_w2, k_b2, hidden_feats, hidden_feats)
    wc, bc = init_linear(k_wc, k_bc, hidden_feats, num_classes)

    ref = reference_forward(adj_mean, x, w1, b1, w2, b2, wc, bc)

    # Exact-math path (f32 MXU operands) -> tight tolerance against the reference.
    out_f32 = gin_forward(adj_mean, x, w1, b1, w2, b2, wc, bc,
                          compute_dtype=jnp.float32)
    out_f32 = jax.block_until_ready(out_f32)
    assert out_f32.shape == (B, num_classes)
    assert np.allclose(np.asarray(out_f32), np.asarray(ref), atol=1e-4, rtol=1e-4)

    # Performance path (bf16 MXU operands, f32 accumulation) -> looser tolerance.
    out_bf16 = gin_forward(adj_mean, x, w1, b1, w2, b2, wc, bc,
                           compute_dtype=jnp.bfloat16)
    out_bf16 = jax.block_until_ready(out_bf16)
    assert out_bf16.shape == (B, num_classes)
    assert np.allclose(np.asarray(out_bf16), np.asarray(ref), atol=1e-1, rtol=1e-1)

    print("KERNEL_OK")
</pallas_src>

<mosaic_0001>
module attributes {stable_mosaic.version = 11 : i64} {
  func.func @gin_kernel(%arg0: i32, %arg1: memref<8x16x16xf32, #tpu.memory_space<vmem>>, %arg2: memref<128x16xf32, #tpu.memory_space<vmem>>, %arg3: memref<16x128xf32, #tpu.memory_space<vmem>>, %arg4: memref<1x128xf32, #tpu.memory_space<vmem>>, %arg5: memref<128x128xf32, #tpu.memory_space<vmem>>, %arg6: memref<1x128xf32, #tpu.memory_space<vmem>>, %arg7: memref<128x128xf32, #tpu.memory_space<vmem>>, %arg8: memref<1x128xf32, #tpu.memory_space<vmem>>, %arg9: memref<8x128xf32, #tpu.memory_space<vmem>>, %arg10: memref<128x128xf32, #tpu.memory_space<vmem>>) attributes {dimension_semantics = [#tpu.dimension_semantics<parallel>], iteration_bounds = array<i64: 2>, scalar_prefetch = 0 : i64, scratch_operands = 1 : i64, tpu.core_type = #tpu.core_type<tc>, window_params = [{transform_indices = @transform_0, window_bounds = array<i64: 8, 16, 16>}, {transform_indices = @transform_1, window_bounds = array<i64: 128, 16>}, {pipeline_mode = #tpu.pipeline_mode<synchronous>, transform_indices = @transform_2, window_bounds = array<i64: 16, 128>}, {pipeline_mode = #tpu.pipeline_mode<synchronous>, transform_indices = @transform_3, window_bounds = array<i64: 1, 128>}, {pipeline_mode = #tpu.pipeline_mode<synchronous>, transform_indices = @transform_4, window_bounds = array<i64: 128, 128>}, {pipeline_mode = #tpu.pipeline_mode<synchronous>, transform_indices = @transform_5, window_bounds = array<i64: 1, 128>}, {pipeline_mode = #tpu.pipeline_mode<synchronous>, transform_indices = @transform_6, window_bounds = array<i64: 128, 128>}, {pipeline_mode = #tpu.pipeline_mode<synchronous>, transform_indices = @transform_7, window_bounds = array<i64: 1, 128>}, {transform_indices = @transform_8, window_bounds = array<i64: 8, 128>}]} {
    %cst = arith.constant 0.000000e+00 : f32
    %0 = vector.broadcast %cst : f32 to vector<128x128xf32>
    %c0 = arith.constant 0 : index
    %c0_0 = arith.constant 0 : index
    %1 = vector.load %arg10[%c0, %c0_0] : memref<128x128xf32, #tpu.memory_space<vmem>>, vector<128x128xf32>
    tpu.vector_store %arg10[%c0, %c0_0], %0 {strides = array<i32>} : memref<128x128xf32, #tpu.memory_space<vmem>>, vector<128x128xf32>,
    %c0_1 = arith.constant 0 : index
    %c0_2 = arith.constant 0 : index
    %c0_3 = arith.constant 0 : index
    %2 = vector.load %arg1[%c0_1, %c0_2, %c0_3] : memref<8x16x16xf32, #tpu.memory_space<vmem>>, vector<1x16x16xf32>
    %3 = vector.shape_cast %2 : vector<1x16x16xf32> to vector<16x16xf32>
    %c0_4 = arith.constant 0 : index
    %c0_5 = arith.constant 0 : index
    %4 = vector.load %arg10[%c0_4, %c0_5] : memref<128x128xf32, #tpu.memory_space<vmem>>, vector<16x16xf32>
    tpu.vector_store %arg10[%c0_4, %c0_5], %3 {strides = array<i32>} : memref<128x128xf32, #tpu.memory_space<vmem>>, vector<16x16xf32>,
    %c1 = arith.constant 1 : index
    %c0_6 = arith.constant 0 : index
    %c0_7 = arith.constant 0 : index
    %5 = vector.load %arg1[%c1, %c0_6, %c0_7] : memref<8x16x16xf32, #tpu.memory_space<vmem>>, vector<1x16x16xf32>
    %6 = vector.shape_cast %5 : vector<1x16x16xf32> to vector<16x16xf32>
    %c16 = arith.constant 16 : index
    %c16_8 = arith.constant 16 : index
    %7 = vector.load %arg10[%c16, %c16_8] : memref<128x128xf32, #tpu.memory_space<vmem>>, vector<16x16xf32>
    tpu.vector_store %arg10[%c16, %c16_8], %6 {strides = array<i32>} : memref<128x128xf32, #tpu.memory_space<vmem>>, vector<16x16xf32>,
    %c2 = arith.constant 2 : index
    %c0_9 = arith.constant 0 : index
    %c0_10 = arith.constant 0 : index
    %8 = vector.load %arg1[%c2, %c0_9, %c0_10] : memref<8x16x16xf32, #tpu.memory_space<vmem>>, vector<1x16x16xf32>
    %9 = vector.shape_cast %8 : vector<1x16x16xf32> to vector<16x16xf32>
    %c32 = arith.constant 32 : index
    %c32_11 = arith.constant 32 : index
    %10 = vector.load %arg10[%c32, %c32_11] : memref<128x128xf32, #tpu.memory_space<vmem>>, vector<16x16xf32>
    tpu.vector_store %arg10[%c32, %c32_11], %9 {strides = array<i32>} : memref<128x128xf32, #tpu.memory_space<vmem>>, vector<16x16xf32>,
    %c3 = arith.constant 3 : index
    %c0_12 = arith.constant 0 : index
    %c0_13 = arith.constant 0 : index
    %11 = vector.load %arg1[%c3, %c0_12, %c0_13] : memref<8x16x16xf32, #tpu.memory_space<vmem>>, vector<1x16x16xf32>
    %12 = vector.shape_cast %11 : vector<1x16x16xf32> to vector<16x16xf32>
    %c48 = arith.constant 48 : index
    %c48_14 = arith.constant 48 : index
    %13 = vector.load %arg10[%c48, %c48_14] : memref<128x128xf32, #tpu.memory_space<vmem>>, vector<16x16xf32>
    tpu.vector_store %arg10[%c48, %c48_14], %12 {strides = array<i32>} : memref<128x128xf32, #tpu.memory_space<vmem>>, vector<16x16xf32>,
    %c4 = arith.constant 4 : index
    %c0_15 = arith.constant 0 : index
    %c0_16 = arith.constant 0 : index
    %14 = vector.load %arg1[%c4, %c0_15, %c0_16] : memref<8x16x16xf32, #tpu.memory_space<vmem>>, vector<1x16x16xf32>
    %15 = vector.shape_cast %14 : vector<1x16x16xf32> to vector<16x16xf32>
    %c64 = arith.constant 64 : index
    %c64_17 = arith.constant 64 : index
    %16 = vector.load %arg10[%c64, %c64_17] : memref<128x128xf32, #tpu.memory_space<vmem>>, vector<16x16xf32>
    tpu.vector_store %arg10[%c64, %c64_17], %15 {strides = array<i32>} : memref<128x128xf32, #tpu.memory_space<vmem>>, vector<16x16xf32>,
    %c5 = arith.constant 5 : index
    %c0_18 = arith.constant 0 : index
    %c0_19 = arith.constant 0 : index
    %17 = vector.load %arg1[%c5, %c0_18, %c0_19] : memref<8x16x16xf32, #tpu.memory_space<vmem>>, vector<1x16x16xf32>
    %18 = vector.shape_cast %17 : vector<1x16x16xf32> to vector<16x16xf32>
    %c80 = arith.constant 80 : index
    %c80_20 = arith.constant 80 : index
    %19 = vector.load %arg10[%c80, %c80_20] : memref<128x128xf32, #tpu.memory_space<vmem>>, vector<16x16xf32>
    tpu.vector_store %arg10[%c80, %c80_20], %18 {strides = array<i32>} : memref<128x128xf32, #tpu.memory_space<vmem>>, vector<16x16xf32>,
    %c6 = arith.constant 6 : index
    %c0_21 = arith.constant 0 : index
    %c0_22 = arith.constant 0 : index
    %20 = vector.load %arg1[%c6, %c0_21, %c0_22] : memref<8x16x16xf32, #tpu.memory_space<vmem>>, vector<1x16x16xf32>
    %21 = vector.shape_cast %20 : vector<1x16x16xf32> to vector<16x16xf32>
    %c96 = arith.constant 96 : index
    %c96_23 = arith.constant 96 : index
    %22 = vector.load %arg10[%c96, %c96_23] : memref<128x128xf32, #tpu.memory_space<vmem>>, vector<16x16xf32>
    tpu.vector_store %arg10[%c96, %c96_23], %21 {strides = array<i32>} : memref<128x128xf32, #tpu.memory_space<vmem>>, vector<16x16xf32>,
    %c7 = arith.constant 7 : index
    %c0_24 = arith.constant 0 : index
    %c0_25 = arith.constant 0 : index
    %23 = vector.load %arg1[%c7, %c0_24, %c0_25] : memref<8x16x16xf32, #tpu.memory_space<vmem>>, vector<1x16x16xf32>
    %24 = vector.shape_cast %23 : vector<1x16x16xf32> to vector<16x16xf32>
    %c112 = arith.constant 112 : index
    %c112_26 = arith.constant 112 : index
    %25 = vector.load %arg10[%c112, %c112_26] : memref<128x128xf32, #tpu.memory_space<vmem>>, vector<16x16xf32>
    tpu.vector_store %arg10[%c112, %c112_26], %24 {strides = array<i32>} : memref<128x128xf32, #tpu.memory_space<vmem>>, vector<16x16xf32>,
    %c0_27 = arith.constant 0 : index
    %c0_28 = arith.constant 0 : index
    %26 = vector.load %arg10[%c0_27, %c0_28] : memref<128x128xf32, #tpu.memory_space<vmem>>, vector<128x128xf32>
    %c0_29 = arith.constant 0 : index
    %c0_30 = arith.constant 0 : index
    %27 = vector.load %arg2[%c0_29, %c0_30] : memref<128x16xf32, #tpu.memory_space<vmem>>, vector<128x16xf32>
    %cst_31 = arith.constant dense<0.000000e+00> : vector<128x16xf32>
    %28 = tpu.matmul %26, %27, %cst_31 {dimension_numbers = #tpu.dot_dimension_numbers<[1], [0], [0], [1], [0, 0, 1, 1], [], []>} : vector<128x128xf32>, vector<128x16xf32>, vector<128x16xf32> -> vector<128x16xf32>
    %c0_32 = arith.constant 0 : index
    %c0_33 = arith.constant 0 : index
    %29 = vector.load %arg3[%c0_32, %c0_33] : memref<16x128xf32, #tpu.memory_space<vmem>>, vector<16x128xf32>
    %cst_34 = arith.constant dense<0.000000e+00> : vector<128x128xf32>
    %30 = tpu.matmul %28, %29, %cst_34 {dimension_numbers = #tpu.dot_dimension_numbers<[1], [0], [0], [1], [0, 0, 1, 1], [], []>} : vector<128x16xf32>, vector<16x128xf32>, vector<128x128xf32> -> vector<128x128xf32>
    %c0_35 = arith.constant 0 : index
    %c0_36 = arith.constant 0 : index
    %31 = vector.load %arg4[%c0_35, %c0_36] : memref<1x128xf32, #tpu.memory_space<vmem>>, vector<1x128xf32>
    %32 = vector.broadcast %31 : vector<1x128xf32> to vector<128x128xf32>
    %33 = arith.addf %30, %32 : vector<128x128xf32>
    %cst_37 = arith.constant 0.000000e+00 : f32
    %34 = vector.broadcast %cst_37 : f32 to vector<128x128xf32>
    %35 = arith.maximumf %33, %34 : vector<128x128xf32>
    %cst_38 = arith.constant dense<0.000000e+00> : vector<128x128xf32>
    %36 = tpu.matmul %26, %35, %cst_38 {dimension_numbers = #tpu.dot_dimension_numbers<[1], [0], [0], [1], [0, 0, 1, 1], [], []>} : vector<128x128xf32>, vector<128x128xf32>, vector<128x128xf32> -> vector<128x128xf32>
    %c0_39 = arith.constant 0 : index
    %c0_40 = arith.constant 0 : index
    %37 = vector.load %arg5[%c0_39, %c0_40] : memref<128x128xf32, #tpu.memory_space<vmem>>, vector<128x128xf32>
    %cst_41 = arith.constant dense<0.000000e+00> : vector<128x128xf32>
    %38 = tpu.matmul %36, %37, %cst_41 {dimension_numbers = #tpu.dot_dimension_numbers<[1], [0], [0], [1], [0, 0, 1, 1], [], []>} : vector<128x128xf32>, vector<128x128xf32>, vector<128x128xf32> -> vector<128x128xf32>
    %c0_42 = arith.constant 0 : index
    %c0_43 = arith.constant 0 : index
    %39 = vector.load %arg6[%c0_42, %c0_43] : memref<1x128xf32, #tpu.memory_space<vmem>>, vector<1x128xf32>
    %40 = vector.broadcast %39 : vector<1x128xf32> to vector<128x128xf32>
    %41 = arith.addf %38, %40 : vector<128x128xf32>
    %42 = vector.shape_cast %41 : vector<128x128xf32> to vector<8x16x128xf32>
    %cst_44 = arith.constant dense<0xFF800000> : vector<8x128xf32>
    %43 = vector.multi_reduction <maximumf>, %42, %cst_44 [1] : vector<8x16x128xf32> to vector<8x128xf32>
    %c0_45 = arith.constant 0 : index
    %c0_46 = arith.constant 0 : index
    %44 = vector.load %arg7[%c0_45, %c0_46] : memref<128x128xf32, #tpu.memory_space<vmem>>, vector<128x128xf32>
    %cst_47 = arith.constant dense<0.000000e+00> : vector<8x128xf32>
    %45 = tpu.matmul %43, %44, %cst_47 {dimension_numbers = #tpu.dot_dimension_numbers<[1], [0], [0], [1], [0, 0, 1, 1], [], []>} : vector<8x128xf32>, vector<128x128xf32>, vector<8x128xf32> -> vector<8x128xf32>
    %c0_48 = arith.constant 0 : index
    %c0_49 = arith.constant 0 : index
    %46 = vector.load %arg8[%c0_48, %c0_49] : memref<1x128xf32, #tpu.memory_space<vmem>>, vector<1x128xf32>
    %47 = vector.broadcast %46 : vector<1x128xf32> to vector<8x128xf32>
    %48 = arith.addf %45, %47 : vector<8x128xf32>
    %c0_50 = arith.constant 0 : index
    %c0_51 = arith.constant 0 : index
    %49 = vector.load %arg9[%c0_50, %c0_51] : memref<8x128xf32, #tpu.memory_space<vmem>>, vector<8x128xf32>
    tpu.vector_store %arg9[%c0_50, %c0_51], %48 {strides = array<i32>} : memref<8x128xf32, #tpu.memory_space<vmem>>, vector<8x128xf32>,
    return
  }
  func.func @transform_0(%arg0: i32) -> (i32, i32, i32) {
    %c0_i32 = arith.constant 0 : i32
    %c0_i32_0 = arith.constant 0 : i32
    %c0_i32_1 = arith.constant 0 : i32
    return %arg0, %c0_i32, %c0_i32_0 : i32, i32, i32
  }
  func.func @transform_1(%arg0: i32) -> (i32, i32) {
    %c0_i32 = arith.constant 0 : i32
    %c0_i32_0 = arith.constant 0 : i32
    return %arg0, %c0_i32 : i32, i32
  }
  func.func @transform_2(%arg0: i32) -> (i32, i32) {
    %c0_i32 = arith.constant 0 : i32
    %c0_i32_0 = arith.constant 0 : i32
    %c0_i32_1 = arith.constant 0 : i32
    return %c0_i32, %c0_i32_0 : i32, i32
  }
  func.func @transform_3(%arg0: i32) -> (i32, i32) {
    %c0_i32 = arith.constant 0 : i32
    %c0_i32_0 = arith.constant 0 : i32
    %c0_i32_1 = arith.constant 0 : i32
    return %c0_i32, %c0_i32_0 : i32, i32
  }
  func.func @transform_4(%arg0: i32) -> (i32, i32) {
    %c0_i32 = arith.constant 0 : i32
    %c0_i32_0 = arith.constant 0 : i32
    %c0_i32_1 = arith.constant 0 : i32
    return %c0_i32, %c0_i32_0 : i32, i32
  }
  func.func @transform_5(%arg0: i32) -> (i32, i32) {
    %c0_i32 = arith.constant 0 : i32
    %c0_i32_0 = arith.constant 0 : i32
    %c0_i32_1 = arith.constant 0 : i32
    return %c0_i32, %c0_i32_0 : i32, i32
  }
  func.func @transform_6(%arg0: i32) -> (i32, i32) {
    %c0_i32 = arith.constant 0 : i32
    %c0_i32_0 = arith.constant 0 : i32
    %c0_i32_1 = arith.constant 0 : i32
    return %c0_i32, %c0_i32_0 : i32, i32
  }
  func.func @transform_7(%arg0: i32) -> (i32, i32) {
    %c0_i32 = arith.constant 0 : i32
    %c0_i32_0 = arith.constant 0 : i32
    %c0_i32_1 = arith.constant 0 : i32
    return %c0_i32, %c0_i32_0 : i32, i32
  }
  func.func @transform_8(%arg0: i32) -> (i32, i32) {
    %c0_i32 = arith.constant 0 : i32
    %c0_i32_0 = arith.constant 0 : i32
    return %arg0, %c0_i32 : i32, i32
  }
}

</mosaic_0001>

<bundles_post_ra>
// kernel: tpu_custom_call.1
= control target key start
LH: loop header
LB: loop body
LE: loop exit
PB: predicated region body
PF: predicated region fallthrough
CT: control target
= control target key end

     0   :  { %13 = vsyncpa [#allocation4], 0  ;;  %s2633_s0 = inlined_call_operand.vmem [shape: f32[16,16,16], index: 0, kind: input, shape index: {}]   ;;  %s2634_s1 = inlined_call_operand.vmem [shape: f32[256,16], index: 1, kind: input, shape index: {}]   ;;  %s2635_s2 = inlined_call_operand.vmem [shape: f32[16,128], index: 2, kind: input, shape index: {}]   ;;  %s2636_s3 = inlined_call_operand.vmem [shape: f32[1,128], index: 3, kind: input, shape index: {}]   ;;  %s2637_s4 = inlined_call_operand.hbm [shape: f32[128,128], index: 4, kind: input, shape index: {}]   ;;  %s2638_s5 = inlined_call_operand.vmem [shape: f32[1,128], index: 5, kind: input, shape index: {}]   ;;  %s2639_s6 = inlined_call_operand.hbm [shape: f32[128,128], index: 6, kind: input, shape index: {}]   ;;  %s2640_s7 = inlined_call_operand.vmem [shape: f32[1,128], index: 7, kind: input, shape index: {}]   ;;  %s2641_s8 = inlined_call_operand.hbm [shape: f32[16,128], index: 8, kind: output, shape index: {}]  }
   0x1   :  { %14 = vsyncpa [#allocation7], 0 }
   0x2   :  { %15 = vsyncpa [#allocation5], 0 }
   0x3   :  { %17 = vsyncpa [#allocation5 + $0x1], 0  ;;  %s2266_s27 = smov 0   ;;  %s2268_s28 = smov 0  }
   0x4   :  { %s2270_s29 = smov 0   ;;  %s2272_s30 = smov 0  }
   0x5 LB: > { %2646 = sst [smem:[#allocation12_spill]] %s2200_s29  ;;  %s2287_s9 = sadd.s32 4294967295, %s2204_s30   ;;  %s2204_s30 = sphi %s2272_s30, %s2664_s30   ;;  %s2200_s29 = sphi %s2270_s29, %s2661_s29   ;;  %s2196_s28 = sphi %s2268_s28, %s2663_s28   ;;  %s2192_s27 = sphi %s2266_s27, %s2662_s27  }
   0x6   : > { %s1468_s10 = sadd.s32 4294967294, %s2204_s30   ;;  %s2291_s11 = sadd.s32 1, %s2204_s30  }
   0x7   : > { %s208_s12 = sadd.s32 1, %s2200_s29  ;;  %s205_s13 = ssub.s32 %s2204_s30, %s2291_s11 }
   0x8   : > { %p218_p0 = scmp.ne.s32.totalorder %s2200_s29, %s2196_s28  ;;  %p206_p1 = scmp.eq.s32.totalorder %s205_s13, 0 }
   0x9   : > { %p219_p2 = scmp.eq.s32.totalorder %s2287_s9, 1  ;;  %p224_p3 = scmp.ne.s32.totalorder %s2196_s28, %s2192_s27 }
   0xa   : > { %p225_p4 = scmp.eq.s32.totalorder %s1468_s10, 1  ;;  %p1469_p7 = scmp.ge.s32.totalorder %s2204_s30, 1 }
   0xb   : > { %s2302_s14 = scalar_select %p206_p1, %s2200_s29, %s208_s12  }
   0xc   : > { %p2304_p5 = por %p219_p2, %p218_p0  ;;  %p2308_p6 = por %p225_p4, %p224_p3 }
   0xd   : > { %2647 = sst [smem:[#allocation13_spill]] %s2302_s14  ;;  %p232_p8 = scmp.lt.s32.totalorder %s2204_s30, 3 }
   0xe   : > { %s2648_s15 = scalar_select %p2304_p5, 1, 0 }
   0xf   : > { %s2649_s16 = scalar_select %p2308_p6, 1, 0 }
  0x10   : > { %p2642_p9 = scmp.eq.s32.totalorder %s2287_s9, 0  ;;  %p2315_p10 = pnand %p1469_p7, %p232_p8 }
  0x11   : > { %s2206_s18 = smov [#allocation3]   ;;  %s2207_s21 = smov [#allocation6]  }
  0x12   : > { %s2650_s17 = scalar_select %p2315_p10, 1, 0 }
  0x13   : > { %s250_s19 = sshll.u32 %s2206_s18, 4  ;;  %p2016_p11 = pneg %p2315_p10  ;;  %s251_s19 = int_to_ptr.vmem [resolvable:$true] %s250_s19 }
  0x14   : > { %s266_s22 = sshll.u32 %s2207_s21, 4  ;;  %s2078_s25 = scalar_lea.hbm %s2637_s4, 2048  ;;  %s2327_s22 = int_to_ptr.vmem [resolvable:$true] %s266_s22 }
  0x15   : > { %p2323_p12 = pnand %p2642_p9, %p2016_p11  ;;  %p2079_p13 = scmp.ne.s32.totalorder %s2637_s4, %s2078_s25 }
  0x16   : > { %p2085_p3 = scmp.lt.u32.totalorder %s2078_s25, %s2637_s4 }
  0x17   : > { %p2080_p0 = pneg %p2323_p12 }
  0x19   : > { %p2081_p1 = pnand %p2080_p0, %p2079_p13 }
  0x1b   : > { %p2082_p2 = pneg %p2081_p1 }
  0x1d   : > { %p2087_p4 = pnand %p2085_p3, %p2082_p2 }
  0x1f   : > { %2090 = shalt.err (!%p2087_p4)
}
  0x20   : > { %s2091_s18 = scalar_lea.vmem %s251_s19, 2048  ;;  %p2099_p9 = scmp.lt.s32.totalorder %s251_s19, %s251_s19 }
  0x21   : > { %p2092_p7 = scmp.ne.s32.totalorder %s251_s19, %s2091_s18  ;;  %p2100_p6 = scmp.lt.s32.totalorder %s2091_s18, %s2091_s18 }
  0x23   : > { %p2094_p8 = pnand %p2092_p7, %p2080_p0  ;;  %p2101_p5 = por %p2100_p6, %p2099_p9 }
  0x25   : > { %p2095_p11 = pneg %p2094_p8 }
  0x27   : > { %p2102_p10 = pnand %p2101_p5, %p2095_p11 }
  0x29   : > { %2105 = shalt.err (!%p2102_p10)
}
  0x2a   : > { %s2208_s21 = smov 128   ;;  %s2209_s23 = smov 8  }
  0x2b   : > { %2019 = dma.hbm_to_vmem [thread:$0]  (!%p2323_p12), %s2637_s4, 2048, %s251_s19, [#allocation4], %s2208_s21, %s2208_s21, %s2209_s23  }
  0x2c   : > { %s2106_s12 = scalar_lea.hbm %s2639_s6, 2048 }
  0x2d   : > { %p2107_p13 = scmp.ne.s32.totalorder %s2639_s6, %s2106_s12  ;;  %p2113_p9 = scmp.lt.u32.totalorder %s2106_s12, %s2639_s6 }
  0x2f   : > { %p2109_p5 = pnand %p2107_p13, %p2080_p0 }
  0x31   : > { %p2110_p6 = pneg %p2109_p5 }
  0x33   : > { %p2115_p10 = pnand %p2113_p9, %p2110_p6 }
  0x35   : > { %2118 = shalt.err (!%p2115_p10)
}
  0x36   : > { %s2119_s19 = scalar_lea.vmem %s2327_s22, 2048  ;;  %p2127_p4 = scmp.lt.s32.totalorder %s2327_s22, %s2327_s22 }
  0x37   : > { %p2120_p1 = scmp.ne.s32.totalorder %s2327_s22, %s2119_s19  ;;  %p2128_p7 = scmp.lt.s32.totalorder %s2119_s19, %s2119_s19 }
  0x39   : > { %p2122_p2 = pnand %p2120_p1, %p2080_p0  ;;  %p2129_p8 = por %p2128_p7, %p2127_p4 }
  0x3b   : > { %p2123_p3 = pneg %p2122_p2 }
  0x3d   : > { %p2130_p11 = pnand %p2129_p8, %p2123_p3 }
  0x3f   : > { %2133 = shalt.err (!%p2130_p11)
}
  0x40   : > { %2022 = dma.hbm_to_vmem [thread:$0]  (!%p2323_p12), %s2639_s6, 2048, %s2327_s22, [#allocation7], %s2208_s21, %s2208_s21, %s2209_s23  }
  0x41   : > { %p2652_p13 = scmp.ne.s32.totalorder %s2650_s17, 0 }
  0x42   : > { %p2653_p5 = scmp.eq.s32.totalorder (!%p2652_p13), %s2287_s9, 0 }
  0x43   : > { %304 = sbr.rel (%p2652_p13) target bundleno = 1374 (0x55e), region = 52 }
  0x4a   : > { %2179 = dma.done.wait (%p2653_p5), [#allocation4], 2048   ;;  %p2654_p0 = pmov %p2653_p5 }
  0x4c   : > { %2181 = vsyncadd (%p2654_p0), [#allocation4], 4294965248  ;;  %p2655_p6 = pmov %p2654_p0 }
  0x4d   : > { %p2656_p9 = pmov %p2654_p0 }
  0x4e   : > { %2183 = dma.done.wait (%p2655_p6), [#allocation7], 2048  }
  0x4f   : > { %2185 = vsyncadd (%p2656_p9), [#allocation7], 4294965248  ;;  %s1477_s20 = sshll.u32 %s2287_s9, 3  ;;  %v2210_v0 = vmov 0.0   ;;  %s1480_s25 = sshll.u32 %s2287_s9, 4  ;;  %vm379_vm0 = vcmask 130048  }
  0x50   : > { %p2387_p10 = scmp.lt.s32.totalorder %s1477_s20, 15  ;;  %363 = vst [vmem:[#allocation2 + $0x10] sm:$0xff] %v2210_v0  ;;  %361 = vst [vmem:[#allocation2] sm:$0xff] %v2210_v0  ;;  %p356_p12 = scmp.lt.s32.totalorder %s1480_s25, 31  ;;  %v657_v36 = vld [vmem:[%s2635_s2] sm:$0xff]  ;;  %v658_v37 = vld [vmem:[%s2635_s2 + $0x8] sm:$0xff] }
  0x51   : > { %362 = vst [vmem:[#allocation2 + $0x8] sm:$0xff] %v2210_v0  ;;  %364 = vst [vmem:[#allocation2 + $0x18] sm:$0xff] %v2210_v0  ;;  %s2211_s26 = smov 16   ;;  %s2212_s10 = smov 32   ;;  %v1914_v40 = vpack.c.bf16 %v658_v37, %v657_v36  ;;  %vm393_vm1 = vcmask 261248   ;;  %vm407_vm2 = vcmask 392448  }
  0x52   : > { %365 = vst [vmem:[#allocation2 + $0x20] sm:$0xff] %v2210_v0  ;;  %366 = vst [vmem:[#allocation2 + $0x28] sm:$0xff] %v2210_v0  ;;  %s2666_s20 = smov (!%p2387_p10, %s1477_s20), 15  ;;  %s2668_s25 = smov (!%p356_p12, %s1480_s25), 31  ;;  %vm421_vm3 = vcmask 523648   ;;  %vm435_vm4 = vcmask 654848  }
  0x53   : > { %367 = vst [vmem:[#allocation2 + $0x30] sm:$0xff] %v2210_v0  ;;  %368 = vst [vmem:[#allocation2 + $0x38] sm:$0xff] %v2210_v0  ;;  %s1519_s17 = sshll.u32 %s2666_s20, 4  ;;  %s1481_s12 = sshll.u32 %s2668_s25, 3  ;;  %1915 = vmatprep.subr.bf16.mxu1 %v1914_v40  ;;  %vm449_vm5 = vcmask 786048   ;;  %vm463_vm6 = vcmask 917248  }
  0x54   : > { %369 = vst [vmem:[#allocation2 + $0x40] sm:$0xff] %v2210_v0  ;;  %370 = vst [vmem:[#allocation2 + $0x48] sm:$0xff] %v2210_v0  ;;  %s2412_s23 = scalar_lea.vmem %s2633_s0, %s1519_s17  ;;  %s2424_s19 = scalar_lea.vmem %s2634_s1, %s1481_s12  ;;  %1917 = vmatpush3.bf16.msra.mxu1 %v1914_v40  ;;  %vm477_vm7 = vcmask 1048448   ;;  %v1020_v36 = vld [vmem:[#allocation3] sm:$0xff]  ;;  %v1021_v37 = vld [vmem:[#allocation3 + $0x8] sm:$0xff]  ;;  %vm2219_vm8 = vmmov 0  }
  0x55   : > { %371 = vst [vmem:[#allocation2 + $0x50] sm:$0xff] %v2210_v0  ;;  %372 = vst [vmem:[#allocation2 + $0x58] sm:$0xff] %v2210_v0  ;;  %v1482_v1 = vld [vmem:[%s2412_s23 + $0x10] sm:$0xff]  ;;  %v1484_v2 = vld [vmem:[%s2412_s23 + $0x20] sm:$0xff]  ;;  %s2213_s29 = smov 48   ;;  %s2214_s14 = smov 64  }
  0x56   : > { %373 = vst [vmem:[#allocation2 + $0x60] sm:$0xff] %v2210_v0  ;;  %374 = vst [vmem:[#allocation2 + $0x68] sm:$0xff] %v2210_v0  ;;  %387 = vrot.lane.b32.xlu0 %v1482_v1, %s2211_s26  ;;  %401 = vrot.lane.b32.xlu1 %v1484_v2, %s2212_s10  ;;  %v1483_v3 = vld [vmem:[%s2412_s23 + $0x18] sm:$0xff]  ;;  %v1485_v4 = vld [vmem:[%s2412_s23 + $0x28] sm:$0xff]  ;;  %s2215_s20 = smov 80   ;;  %s2216_s24 = smov 96  }
  0x57   : > { %375 = vst [vmem:[#allocation2 + $0x70] sm:$0xff] %v2210_v0  ;;  %376 = vst [vmem:[#allocation2 + $0x78] sm:$0xff] %v2210_v0  ;;  %v1486_v5 = vld [vmem:[%s2412_s23 + $0x30] sm:$0xff]  ;;  %v1487_v6 = vld [vmem:[%s2412_s23 + $0x38] sm:$0xff]  ;;  %vm1275_vm9 = vcmask 1041409   ;;  %vm1277_vm10 = vcmask 1042434  }
  0x58   : > { %v377_v7 = vld [vmem:[%s2412_s23] sm:$0xff]  ;;  %v378_v8 = vld [vmem:[%s2412_s23 + $0x8] sm:$0xff]  ;;  %v498_v11 = vld [vmem:[%s2424_s19 + $0x10] sm:$0xff]  ;;  %vm1279_vm11 = vcmask 1043459   ;;  %vm1281_vm12 = vcmask 1044484   ;;  %vm1283_vm13 = vcmask 1045509  }
  0x59   : > { %v496_v9 = vld [vmem:[%s2424_s19] sm:$0xff]  ;;  %v497_v10 = vld [vmem:[%s2424_s19 + $0x8] sm:$0xff]  ;;  %380 = vst.msk [vmem:[#allocation2] sm:$0xff] %vm379_vm0, %v377_v7  ;;  %381 = vst.msk [vmem:[#allocation2 + $0x8] sm:$0xff] %vm379_vm0, %v378_v8  ;;  %vm1285_vm14 = vcmask 1046534   ;;  %vm1287_vm15 = vcmask 1047559  }
  0x5a   : > { %389 = vrot.lane.b32.xlu0 %v1483_v3, %s2211_s26  ;;  %403 = vrot.lane.b32.xlu1 %v1485_v4, %s2212_s10  ;;  %v1882_v12 = vpack.c.bf16 %v497_v10, %v496_v9  ;;  %v499_v13 = vld [vmem:[%s2424_s19 + $0x18] sm:$0xff]  ;;  %v500_v15 = vld [vmem:[%s2424_s19 + $0x20] sm:$0xff]  ;;  %s2217_s26 = smov 112   ;;  %s345_s18 = sand.u32 1, %s2196_s28  }
  0x5b   : > { %v1886_v14 = vpack.c.bf16 %v499_v13, %v498_v11  ;;  %v501_v16 = vld [vmem:[%s2424_s19 + $0x28] sm:$0xff]  ;;  %v1488_v17 = vld [vmem:[%s2412_s23 + $0x40] sm:$0xff]  ;;  %v502_v20 = vld [vmem:[%s2424_s19 + $0x30] sm:$0xff]  ;;  %p2658_p2 = scmp.ne.s32.totalorder %s2648_s15, 0 }
  0x5c   : > { %v1489_v18 = vld [vmem:[%s2412_s23 + $0x48] sm:$0xff]  ;;  %1883 = vmatprep.subr.bf16.mxu0 %v1882_v12  ;;  %v1890_v19 = vpack.c.bf16 %v501_v16, %v500_v15  ;;  %v503_v21 = vld [vmem:[%s2424_s19 + $0x38] sm:$0xff]  ;;  %v1490_v23 = vld [vmem:[%s2412_s23 + $0x50] sm:$0xff] }
  0x5d   : > { %1885 = vmatpush3.bf16.msra.mxu0 %v1882_v12  ;;  %v1491_v24 = vld [vmem:[%s2412_s23 + $0x58] sm:$0xff]  ;;  %v1894_v25 = vpack.c.bf16 %v503_v21, %v502_v20  ;;  %v504_v26 = vld [vmem:[%s2424_s19 + $0x40] sm:$0xff]  ;;  %v505_v27 = vld [vmem:[%s2424_s19 + $0x48] sm:$0xff] }
  0x5e   : > { %415 = vrot.lane.b32.xlu0 %v1486_v5, %s2213_s29  ;;  %417 = vrot.lane.b32.xlu1 %v1487_v6, %s2213_s29  ;;  %v1492_v28 = vld [vmem:[%s2412_s23 + $0x60] sm:$0xff]  ;;  %v1493_v29 = vld [vmem:[%s2412_s23 + $0x68] sm:$0xff]  ;;  %v1898_v30 = vpack.c.bf16 %v505_v27, %v504_v26 }
  0x5f   : > { %1887 = vmatprep.subr.bf16.mxu0 %v1886_v14  ;;  %v506_v31 = vld [vmem:[%s2424_s19 + $0x50] sm:$0xff]  ;;  %v507_v32 = vld [vmem:[%s2424_s19 + $0x58] sm:$0xff]  ;;  %v508_v38 = vld [vmem:[%s2424_s19 + $0x60] sm:$0xff] }
  0x60   : > { %v2440_v22 = vld [vmem:[#allocation2] sm:$0xff]  ;;  %v1494_v33 = vld [vmem:[%s2412_s23 + $0x70] sm:$0xff]  ;;  %v1495_v34 = vld [vmem:[%s2412_s23 + $0x78] sm:$0xff]  ;;  %v1902_v35 = vpack.c.bf16 %v507_v32, %v506_v31 }
  0x61   : > { %1683 = vmatprep.mubr.f32.mxu0 %v2440_v22  ;;  %1889 = vmatpush3.bf16.msra.mxu0 %v1886_v14  ;;  %v509_v39 = vld [vmem:[%s2424_s19 + $0x68] sm:$0xff]  ;;  %v510_v42 = vld [vmem:[%s2424_s19 + $0x70] sm:$0xff]  ;;  %v511_v43 = vld [vmem:[%s2424_s19 + $0x78] sm:$0xff]  ;;  %s1476_s19 = sshll.u32 %s345_s18, 3 }
  0x62   : > { %429 = vrot.lane.b32.xlu0 %v1488_v17, %s2214_s14  ;;  %431 = vrot.lane.b32.xlu1 %v1489_v18, %s2214_s14  ;;  %v1906_v41 = vpack.c.bf16 %v509_v39, %v508_v38  ;;  %v1910_v44 = vpack.c.bf16 %v511_v43, %v510_v42  ;;  %v2463_v45 = vld [vmem:[#allocation2 + $0x8] sm:$0xff]  ;;  %v1022_v38 = vld [vmem:[#allocation3 + $0x10] sm:$0xff]  ;;  %v1023_v39 = vld [vmem:[#allocation3 + $0x18] sm:$0xff] }
  0x63   : > { %1891 = vmatprep.subr.bf16.mxu0 %v1890_v19  ;;  %v1954_v40 = vpack.c.bf16 %v1023_v39, %v1022_v38  ;;  %v1025_v42 = vld [vmem:[#allocation3 + $0x28] sm:$0xff] }
  0x65   : > { %1893 = vmatpush3.bf16.msra.mxu0 %v1890_v19 }
  0x66   : > { %443 = vrot.lane.b32.xlu0 %v1490_v23, %s2215_s20  ;;  %445 = vrot.lane.b32.xlu1 %v1491_v24, %s2215_s20  ;;  %s1516_s20 = sshll.u32 %s2287_s9, 7  ;;  %s2220_s9 = smov [#allocation8]  }
  0x67   : > { %1895 = vmatprep.subr.bf16.mxu0 %v1894_v25  ;;  %s2591_s25 = scalar_lea.hbm %s2641_s8, %s1516_s20  ;;  %s2138_s10 = sshll.u32 %s2220_s9, 4  ;;  %s2139_s10 = int_to_ptr.vmem [resolvable:$false] %s2138_s10 }
  0x68   : > { %s2140_s12 = scalar_lea.vmem %s2139_s10, 256 }
  0x69   : > { %1897 = vmatpush3.bf16.msra.mxu0 %v1894_v25 }
  0x6a   : > { %457 = vrot.lane.b32.xlu0 %v1492_v28, %s2216_s24  ;;  %459 = vrot.lane.b32.xlu1 %v1493_v29, %s2216_s24  ;;  %v2528_v28 = vld [vmem:[%s2636_s3] ss:$0 sm:$0xff]  ;;  %s347_s24 = scalar_lea.vmem [#allocation8], %s1476_s19 }
  0x6b   : > { %1899 = vmatprep.subr.bf16.mxu0 %v1898_v30  ;;  %s1375_s17 = sshll.u32 %s347_s24, 4  ;;  %s2593_s17 = int_to_ptr.vmem [resolvable:$true] %s1375_s17 }
  0x6c   : > { %s2134_s23 = scalar_lea.vmem %s2593_s17, 128  ;;  %p2141_p7 = scmp.lt.s32.totalorder %s2593_s17, %s2139_s10 }
  0x6d   : > { %1901 = vmatpush3.bf16.msra.mxu0 %v1898_v30  ;;  %p2135_p1 = scmp.ne.s32.totalorder %s2593_s17, %s2134_s23  ;;  %p2142_p8 = scmp.lt.s32.totalorder %s2140_s12, %s2134_s23 }
  0x6e   : > { %471 = vrot.lane.b32.xlu0 %v1494_v33, %s2217_s26  ;;  %473 = vrot.lane.b32.xlu1 %v1495_v34, %s2217_s26  ;;  %s1362_s26 = scalar_lea.sflag [#allocation5], %s345_s18 }
  0x6f   : > { %1903 = vmatprep.subr.bf16.mxu0 %v1902_v35  ;;  %p2136_p3 = pnand %p2135_p1, %p2658_p2  ;;  %p2143_p11 = por %p2142_p8, %p2141_p7 }
  0x71   : > { %1905 = vmatpush3.bf16.msra.mxu0 %v1902_v35  ;;  %p2137_p4 = pneg %p2136_p3 }
  0x72   : > { %1907 = vmatprep.subr.bf16.mxu0 %v1906_v41 }
  0x73   : > { %p2144_p13 = pnand %p2143_p11, %p2137_p4 }
  0x75   : > { %1909 = vmatpush3.bf16.msra.mxu0 %v1906_v41  ;;  %v1024_v41 = vld [vmem:[#allocation3 + $0x20] sm:$0xff] }
  0x76   : > { %1911 = vmatprep.subr.bf16.mxu0 %v1910_v44  ;;  %v1958_v43 = vpack.c.bf16 %v1025_v42, %v1024_v41 }
  0x79   : > { %1913 = vmatpush3.bf16.msra.mxu0 %v1910_v44  ;;  %v1026_v44 = vld [vmem:[#allocation3 + $0x30] sm:$0xff] }
  0x7c   : > { %1684 = vmatmul.mubr.f32.vlgmr.msra.gmra.mrb[0].mxu0 %v2463_v45 }
  0xc8   : > { %v388_v46 = vpop.permute.xlu0 %387  ;;  %v402_v47 = vpop.permute.xlu1 %401 }
  0xc9   : > { %394 = vst.msk [vmem:[#allocation2 + $0x10] sm:$0xff] %vm393_vm1, %v388_v46  ;;  %v1027_v46 = vld [vmem:[#allocation3 + $0x38] sm:$0xff] }
  0xca   : > { %408 = vst.msk [vmem:[#allocation2 + $0x20] sm:$0xff] %vm407_vm2, %v402_v47  ;;  %v1962_v47 = vpack.c.bf16 %v1027_v46, %v1026_v44 }
  0xcc   : > { %v390_v48 = vpop.permute.xlu0 %389  ;;  %v404_v49 = vpop.permute.xlu1 %403 }
  0xcd   : > { %395 = vst.msk [vmem:[#allocation2 + $0x18] sm:$0xff] %vm393_vm1, %v390_v48  ;;  %v1028_v48 = vld [vmem:[#allocation3 + $0x40] sm:$0xff] }
  0xce   : > { %409 = vst.msk [vmem:[#allocation2 + $0x28] sm:$0xff] %vm407_vm2, %v404_v49  ;;  %v1029_v49 = vld [vmem:[#allocation3 + $0x48] sm:$0xff] }
  0xd0   : > { %v2466_v50 = vld [vmem:[#allocation2 + $0x10] sm:$0xff]  ;;  %v416_v51 = vpop.permute.xlu0 %415  ;;  %v418_v52 = vpop.permute.xlu1 %417 }
  0xd1   : > { %1686 = vmatprep.mubr.f32.mxu0 %v2466_v50  ;;  %422 = vst.msk [vmem:[#allocation2 + $0x30] sm:$0xff] %vm421_vm3, %v416_v51  ;;  %423 = vst.msk [vmem:[#allocation2 + $0x38] sm:$0xff] %vm421_vm3, %v418_v52  ;;  %v2469_v53 = vld [vmem:[#allocation2 + $0x20] sm:$0xff]  ;;  %v1966_v51 = vpack.c.bf16 %v1029_v49, %v1028_v48  ;;  %v1030_v52 = vld [vmem:[#allocation3 + $0x50] sm:$0xff] }
  0xd4   : > { %v2471_v54 = vld [vmem:[#allocation2 + $0x18] sm:$0xff]  ;;  %v430_v55 = vpop.permute.xlu0 %429  ;;  %v432_v56 = vpop.permute.xlu1 %431 }
  0xd5   : > { %1687 = vmatmul.mubr.f32.gmra.mrb[2].mxu0 %v2471_v54  ;;  %436 = vst.msk [vmem:[#allocation2 + $0x40] sm:$0xff] %vm435_vm4, %v430_v55  ;;  %437 = vst.msk [vmem:[#allocation2 + $0x48] sm:$0xff] %vm435_vm4, %v432_v56  ;;  %v2475_v57 = vld [vmem:[#allocation2 + $0x28] sm:$0xff]  ;;  %v1031_v55 = vld [vmem:[#allocation3 + $0x58] sm:$0xff] }
  0xd6   : > { %1689 = vmatprep.mubr.f32.mxu0 %v2469_v53  ;;  %v1970_v56 = vpack.c.bf16 %v1031_v55, %v1030_v52 }
  0xd8   : > { %v444_v58 = vpop.permute.xlu0 %443  ;;  %v446_v59 = vpop.permute.xlu1 %445  ;;  %v2477_v60 = vld [vmem:[#allocation2 + $0x30] sm:$0xff]  ;;  %v2481_v61 = vld [vmem:[#allocation2 + $0x38] sm:$0xff] }
  0xd9   : > { %1690 = vmatmul.mubr.f32.gmra.mrb[4].mxu0 %v2475_v57  ;;  %450 = vst.msk [vmem:[#allocation2 + $0x50] sm:$0xff] %vm449_vm5, %v444_v58  ;;  %451 = vst.msk [vmem:[#allocation2 + $0x58] sm:$0xff] %vm449_vm5, %v446_v59  ;;  %v1032_v58 = vld [vmem:[#allocation3 + $0x60] sm:$0xff]  ;;  %v1033_v59 = vld [vmem:[#allocation3 + $0x68] sm:$0xff] }
  0xda   : > { %1692 = vmatprep.mubr.f32.mxu0 %v2477_v60 }
  0xdc   : > { %v458_v62 = vpop.permute.xlu0 %457  ;;  %v460_v63 = vpop.permute.xlu1 %459  ;;  %v2483_v1 = vld [vmem:[#allocation2 + $0x40] sm:$0xff]  ;;  %v2487_v2 = vld [vmem:[#allocation2 + $0x48] sm:$0xff] }
  0xdd   : > { %1693 = vmatmul.mubr.f32.gmra.mrb[6].mxu0 %v2481_v61  ;;  %464 = vst.msk [vmem:[#allocation2 + $0x60] sm:$0xff] %vm463_vm6, %v458_v62  ;;  %465 = vst.msk [vmem:[#allocation2 + $0x68] sm:$0xff] %vm463_vm6, %v460_v63  ;;  %v1974_v62 = vpack.c.bf16 %v1033_v59, %v1032_v58  ;;  %v1034_v63 = vld [vmem:[#allocation3 + $0x70] sm:$0xff] }
  0xde   : > { %1695 = vmatprep.mubr.f32.mxu0 %v2483_v1 }
  0xe0   : > { %v472_v3 = vpop.permute.xlu0 %471  ;;  %v474_v4 = vpop.permute.xlu1 %473  ;;  %v2489_v5 = vld [vmem:[#allocation2 + $0x50] sm:$0xff]  ;;  %v2493_v6 = vld [vmem:[#allocation2 + $0x58] sm:$0xff] }
  0xe1   : > { %1696 = vmatmul.mubr.f32.gmra.mrb[8].mxu0 %v2487_v2  ;;  %478 = vst.msk [vmem:[#allocation2 + $0x70] sm:$0xff] %vm477_vm7, %v472_v3  ;;  %479 = vst.msk [vmem:[#allocation2 + $0x78] sm:$0xff] %vm477_vm7, %v474_v4  ;;  %v1035_v3 = vld [vmem:[#allocation3 + $0x78] sm:$0xff] }
  0xe2   : > { %1698 = vmatprep.mubr.f32.mxu0 %v2489_v5  ;;  %v1978_v4 = vpack.c.bf16 %v1035_v3, %v1034_v63 }
  0xe4   : > { %v2495_v7 = vld [vmem:[#allocation2 + $0x60] sm:$0xff]  ;;  %v2499_v8 = vld [vmem:[#allocation2 + $0x68] sm:$0xff] }
  0xe5   : > { %1699 = vmatmul.mubr.f32.gmra.mrb[10].mxu0 %v2493_v6 }
  0xe6   : > { %1701 = vmatprep.mubr.f32.mxu0 %v2495_v7 }
  0xe8   : > { %v2501_v9 = vld [vmem:[#allocation2 + $0x70] sm:$0xff]  ;;  %v2505_v10 = vld [vmem:[#allocation2 + $0x78] sm:$0xff] }
  0xe9   : > { %1702 = vmatmul.mubr.f32.gmra.mrb[12].mxu0 %v2499_v8 }
  0xea   : > { %1704 = vmatprep.mubr.f32.mxu0 %v2501_v9 }
  0xed   : > { %1705 = vmatmul.mubr.f32.gmra.mrb[14].mxu0 %v2505_v10 }
 0x14f   : > { %v1685_v11 = vpop.f32.mrb[0].mxu0 }
 0x150   : > { %v578_v12 = vpop.f32.mrb[1].mxu0 }
 0x151   : > { %1711 = vmatprep.mubr.msk.f32.mxu1 %vm379_vm0, %v578_v12 }
 0x152   : > { %1712 = vmatmul.mubr.msk.f32.vlgmr.msra.gmra.mrb[0].mxu1 %vm379_vm0, %v1685_v11 }
 0x1a8   : > { %v1688_v13 = vpop.f32.mrb[2].mxu0 }
 0x1a9   : > { %v588_v14 = vpop.f32.mrb[3].mxu0 }
 0x1aa   : > { %1714 = vmatprep.mubr.msk.f32.mxu1 %vm379_vm0, %v588_v14 }
 0x1ab   : > { %1715 = vmatmul.mubr.msk.f32.gmra.mrb[2].mxu1 %vm379_vm0, %v1688_v13 }
 0x1ac   : > { %v1691_v15 = vpop.f32.mrb[4].mxu0 }
 0x1ad   : > { %v598_v16 = vpop.f32.mrb[5].mxu0 }
 0x1ae   : > { %1717 = vmatprep.mubr.msk.f32.mxu1 %vm379_vm0, %v598_v16 }
 0x1af   : > { %1718 = vmatmul.mubr.msk.f32.gmra.mrb[4].mxu1 %vm379_vm0, %v1691_v15 }
 0x1b0   : > { %v1694_v17 = vpop.f32.mrb[6].mxu0 }
 0x1b1   : > { %v608_v18 = vpop.f32.mrb[7].mxu0 }
 0x1b2   : > { %1720 = vmatprep.mubr.msk.f32.mxu1 %vm379_vm0, %v608_v18 }
 0x1b3   : > { %1721 = vmatmul.mubr.msk.f32.gmra.mrb[6].mxu1 %vm379_vm0, %v1694_v17 }
 0x1b4   : > { %v1697_v19 = vpop.f32.mrb[8].mxu0 }
 0x1b5   : > { %v618_v20 = vpop.f32.mrb[9].mxu0 }
 0x1b6   : > { %1723 = vmatprep.mubr.msk.f32.mxu1 %vm379_vm0, %v618_v20 }
 0x1b7   : > { %1724 = vmatmul.mubr.msk.f32.gmra.mrb[8].mxu1 %vm379_vm0, %v1697_v19 }
 0x1b8   : > { %v1700_v21 = vpop.f32.mrb[10].mxu0 }
 0x1b9   : > { %v628_v23 = vpop.f32.mrb[11].mxu0 }
 0x1ba   : > { %1726 = vmatprep.mubr.msk.f32.mxu1 %vm379_vm0, %v628_v23 }
 0x1bb   : > { %1727 = vmatmul.mubr.msk.f32.gmra.mrb[10].mxu1 %vm379_vm0, %v1700_v21 }
 0x1bc   : > { %v1703_v24 = vpop.f32.mrb[12].mxu0 }
 0x1bd   : > { %v638_v25 = vpop.f32.mrb[13].mxu0 }
 0x1be   : > { %1729 = vmatprep.mubr.msk.f32.mxu1 %vm379_vm0, %v638_v25 }
 0x1bf   : > { %1730 = vmatmul.mubr.msk.f32.gmra.mrb[12].mxu1 %vm379_vm0, %v1703_v24 }
 0x1c0   : > { %v1706_v26 = vpop.f32.mrb[14].mxu0 }
 0x1c1   : > { %v648_v27 = vpop.f32.mrb[15].mxu0 }
 0x1c2   : > { %1732 = vmatprep.mubr.msk.f32.mxu1 %vm379_vm0, %v648_v27 }
 0x1c3   : > { %1733 = vmatmul.mubr.msk.f32.gmra.mrb[14].mxu1 %vm379_vm0, %v1706_v26 }
 0x1c4   : > { %1767 = vmatprep.mubr.f32.mxu1 %v2440_v22  ;;  %v1950_v22 = vpack.c.bf16 %v1021_v37, %v1020_v36 }
 0x1c6   : > { %1951 = vmatprep.subr.bf16.mxu0 %v1950_v22 }
 0x1c7   : > { %1953 = vmatpush3.bf16.msra.mxu0 %v1950_v22 }
 0x1c8   : > { %1955 = vmatprep.subr.bf16.mxu0 %v1954_v40 }
 0x1cb   : > { %1957 = vmatpush3.bf16.msra.mxu0 %v1954_v40 }
 0x1cc   : > { %1959 = vmatprep.subr.bf16.mxu0 %v1958_v43 }
 0x1cf   : > { %1961 = vmatpush3.bf16.msra.mxu0 %v1958_v43 }
 0x1d0   : > { %1963 = vmatprep.subr.bf16.mxu0 %v1962_v47 }
 0x1d3   : > { %1965 = vmatpush3.bf16.msra.mxu0 %v1962_v47 }
 0x1d4   : > { %1967 = vmatprep.subr.bf16.mxu0 %v1966_v51 }
 0x1d7   : > { %1969 = vmatpush3.bf16.msra.mxu0 %v1966_v51 }
 0x1d8   : > { %1971 = vmatprep.subr.bf16.mxu0 %v1970_v56 }
 0x1db   : > { %1973 = vmatpush3.bf16.msra.mxu0 %v1970_v56 }
 0x1dc   : > { %1975 = vmatprep.subr.bf16.mxu0 %v1974_v62 }
 0x1df   : > { %1977 = vmatpush3.bf16.msra.mxu0 %v1974_v62 }
 0x1e0   : > { %1979 = vmatprep.subr.bf16.mxu0 %v1978_v4 }
 0x1e3   : > { %1981 = vmatpush3.bf16.msra.mxu0 %v1978_v4 }
 0x225   : > { %v1713_v29 = vpop.f32.mrb[0].mxu1 }
 0x226   : > { %v786_v30 = vadd.f32 %v1713_v29, %v2528_v28  ;;  %v780_v31 = vpop.f32.mrb[1].mxu1 }
 0x227   : > { %v781_v32 = vadd.f32 %v2528_v28, %v780_v31 }
 0x228   : > { %v860_v33 = vmax.f32 %v786_v30, 0.0 }
 0x229   : > { %v859_v34 = vmax.f32 %v781_v32, 0.0 }
 0x22b   : > { %v1918_v35 = vpack.c.bf16 %v860_v33, %v859_v34 }
 0x22d   : > { %1919 = vmatprep.subr.bf16.mxu1 %v1918_v35 }
 0x22e   : > { %1921 = vmatpush3.bf16.msra.mxu1 %v1918_v35 }
 0x27e   : > { %v1716_v11 = vpop.f32.mrb[2].mxu1 }
 0x27f   : > { %v796_v12 = vadd.f32 %v1716_v11, %v2528_v28  ;;  %v790_v13 = vpop.f32.mrb[3].mxu1 }
 0x280   : > { %v791_v14 = vadd.f32 %v2528_v28, %v790_v13  ;;  %v1244_v13 = vld [vmem:[#allocation6] sm:$0xff] }
 0x281   : > { %v862_v15 = vmax.f32 %v796_v12, 0.0 }
 0x282   : > { %v861_v16 = vmax.f32 %v791_v14, 0.0  ;;  %v1719_v17 = vpop.f32.mrb[4].mxu1  ;;  %v1245_v14 = vld [vmem:[#allocation6 + $0x8] sm:$0xff] }
 0x283   : > { %v806_v18 = vadd.f32 %v1719_v17, %v2528_v28  ;;  %v800_v19 = vpop.f32.mrb[5].mxu1  ;;  %v1246_v17 = vld [vmem:[#allocation6 + $0x10] sm:$0xff] }
 0x284   : > { %v1922_v20 = vpack.c.bf16 %v862_v15, %v861_v16  ;;  %v801_v21 = vadd.f32 %v2528_v28, %v800_v19  ;;  %v1983_v15 = vpack.c.bf16 %v1245_v14, %v1244_v13  ;;  %v2218_v16 = vmov 0.0|0.0  }
 0x285   : > { %v864_v23 = vmax.f32 %v806_v18, 0.0  ;;  %v1247_v18 = vld [vmem:[#allocation6 + $0x18] sm:$0xff] }
 0x286   : > { %v863_v24 = vmax.f32 %v801_v21, 0.0  ;;  %v1722_v25 = vpop.f32.mrb[6].mxu1  ;;  %1923 = vmatprep.subr.bf16.mxu1 %v1922_v20  ;;  %v1986_v19 = vpack.c.bf16 %v1247_v18, %v1246_v17  ;;  %v1249_v21 = vld [vmem:[#allocation6 + $0x28] sm:$0xff] }
 0x287   : > { %v816_v26 = vadd.f32 %v1722_v25, %v2528_v28  ;;  %v810_v27 = vpop.f32.mrb[7].mxu1  ;;  %1925 = vmatpush3.bf16.msra.mxu1 %v1922_v20  ;;  %v1248_v20 = vld [vmem:[#allocation6 + $0x20] sm:$0xff]  ;;  %v1251_v25 = vld [vmem:[#allocation6 + $0x38] sm:$0xff] }
 0x288   : > { %v1926_v29 = vpack.c.bf16 %v864_v23, %v863_v24  ;;  %v811_v30 = vadd.f32 %v2528_v28, %v810_v27  ;;  %v1989_v23 = vpack.c.bf16 %v1249_v21, %v1248_v20  ;;  %v1250_v24 = vld [vmem:[#allocation6 + $0x30] sm:$0xff]  ;;  %v1252_v27 = vld [vmem:[#allocation6 + $0x40] sm:$0xff] }
 0x289   : > { %v866_v31 = vmax.f32 %v816_v26, 0.0  ;;  %v1992_v26 = vpack.c.bf16 %v1251_v25, %v1250_v24 }
 0x28a   : > { %v865_v32 = vmax.f32 %v811_v30, 0.0  ;;  %v1725_v33 = vpop.f32.mrb[8].mxu1  ;;  %1927 = vmatprep.subr.bf16.mxu1 %v1926_v29 }
 0x28b   : > { %v826_v34 = vadd.f32 %v1725_v33, %v2528_v28  ;;  %v820_v35 = vpop.f32.mrb[9].mxu1  ;;  %1929 = vmatpush3.bf16.msra.mxu1 %v1926_v29  ;;  %v1253_v29 = vld [vmem:[#allocation6 + $0x48] sm:$0xff] }
 0x28c   : > { %v1930_v36 = vpack.c.bf16 %v866_v31, %v865_v32  ;;  %v821_v37 = vadd.f32 %v2528_v28, %v820_v35  ;;  %v1995_v30 = vpack.c.bf16 %v1253_v29, %v1252_v27  ;;  %v1254_v31 = vld [vmem:[#allocation6 + $0x50] sm:$0xff]  ;;  %v1255_v32 = vld [vmem:[#allocation6 + $0x58] sm:$0xff]  ;;  %v1257_v35 = vld [vmem:[#allocation6 + $0x68] sm:$0xff] }
 0x28d   : > { %v868_v38 = vmax.f32 %v826_v34, 0.0  ;;  %v1998_v33 = vpack.c.bf16 %v1255_v32, %v1254_v31  ;;  %v1256_v34 = vld [vmem:[#allocation6 + $0x60] sm:$0xff] }
 0x28e   : > { %v867_v22 = vmax.f32 %v821_v37, 0.0  ;;  %v1728_v39 = vpop.f32.mrb[10].mxu1  ;;  %1931 = vmatprep.subr.bf16.mxu1 %v1930_v36  ;;  %v1258_v37 = vld [vmem:[#allocation6 + $0x70] sm:$0xff] }
 0x28f   : > { %v836_v40 = vadd.f32 %v1728_v39, %v2528_v28  ;;  %v830_v41 = vpop.f32.mrb[11].mxu1  ;;  %1933 = vmatpush3.bf16.msra.mxu1 %v1930_v36  ;;  %v2001_v36 = vpack.c.bf16 %v1257_v35, %v1256_v34  ;;  %v2565_v39 = vld [vmem:[%s2638_s5] ss:$0 sm:$0xff] }
 0x290   : > { %v1934_v42 = vpack.c.bf16 %v868_v38, %v867_v22  ;;  %v831_v43 = vadd.f32 %v2528_v28, %v830_v41  ;;  %v1259_v38 = vld [vmem:[#allocation6 + $0x78] sm:$0xff] }
 0x291   : > { %v870_v44 = vmax.f32 %v836_v40, 0.0  ;;  %v2004_v22 = vpack.c.bf16 %v1259_v38, %v1258_v37 }
 0x292   : > { %v869_v46 = vmax.f32 %v831_v43, 0.0  ;;  %v1731_v47 = vpop.f32.mrb[12].mxu1  ;;  %1935 = vmatprep.subr.bf16.mxu1 %v1934_v42 }
 0x293   : > { %v846_v48 = vadd.f32 %v1731_v47, %v2528_v28  ;;  %v840_v49 = vpop.f32.mrb[13].mxu1  ;;  %1937 = vmatpush3.bf16.msra.mxu1 %v1934_v42 }
 0x294   : > { %v1938_v51 = vpack.c.bf16 %v870_v44, %v869_v46  ;;  %v841_v52 = vadd.f32 %v2528_v28, %v840_v49 }
 0x295   : > { %v872_v55 = vmax.f32 %v846_v48, 0.0 }
 0x296   : > { %v871_v56 = vmax.f32 %v841_v52, 0.0  ;;  %v1734_v58 = vpop.f32.mrb[14].mxu1  ;;  %1939 = vmatprep.subr.bf16.mxu1 %v1938_v51 }
 0x297   : > { %v856_v59 = vadd.f32 %v1734_v58, %v2528_v28  ;;  %v850_v62 = vpop.f32.mrb[15].mxu1  ;;  %1941 = vmatpush3.bf16.msra.mxu1 %v1938_v51 }
 0x298   : > { %v1942_v63 = vpack.c.bf16 %v872_v55, %v871_v56  ;;  %v851_v3 = vadd.f32 %v2528_v28, %v850_v62 }
 0x299   : > { %v874_v4 = vmax.f32 %v856_v59, 0.0 }
 0x29a   : > { %v873_v11 = vmax.f32 %v851_v3, 0.0  ;;  %1943 = vmatprep.subr.bf16.mxu1 %v1942_v63 }
 0x29b   : > { %1945 = vmatpush3.bf16.msra.mxu1 %v1942_v63 }
 0x29c   : > { %v1946_v12 = vpack.c.bf16 %v874_v4, %v873_v11 }
 0x29e   : > { %1947 = vmatprep.subr.bf16.mxu1 %v1946_v12 }
 0x29f   : > { %1949 = vmatpush3.bf16.msra.mxu1 %v1946_v12 }
 0x2a0   : > { %1982 = vmatprep.subr.bf16.mxu1 %v2218_v16 }
 0x2a2   : > { %1768 = vmatmul.mubr.f32.vlgmr.msra.gmra.mrb[16].mxu1 %v2463_v45 }
 0x2a3   : > { %1770 = vmatprep.mubr.f32.mxu1 %v2466_v50  ;;  %1984 = vmatpush3.bf16.msra.mxu1 %v1983_v15 }
 0x2a4   : > { %1985 = vmatprep.subr.bf16.mxu1 %v2218_v16 }
 0x2a6   : > { %1771 = vmatmul.mubr.f32.gmra.mrb[18].mxu1 %v2471_v54 }
 0x2a7   : > { %1773 = vmatprep.mubr.f32.mxu1 %v2469_v53  ;;  %1987 = vmatpush3.bf16.msra.mxu1 %v1986_v19 }
 0x2a8   : > { %1988 = vmatprep.subr.bf16.mxu1 %v2218_v16 }
 0x2aa   : > { %1774 = vmatmul.mubr.f32.gmra.mrb[20].mxu1 %v2475_v57 }
 0x2ab   : > { %1776 = vmatprep.mubr.f32.mxu1 %v2477_v60  ;;  %1990 = vmatpush3.bf16.msra.mxu1 %v1989_v23 }
 0x2ac   : > { %1991 = vmatprep.subr.bf16.mxu1 %v2218_v16 }
 0x2ae   : > { %1777 = vmatmul.mubr.f32.gmra.mrb[22].mxu1 %v2481_v61 }
 0x2af   : > { %1779 = vmatprep.mubr.f32.mxu1 %v2483_v1  ;;  %1993 = vmatpush3.bf16.msra.mxu1 %v1992_v26 }
 0x2b0   : > { %1994 = vmatprep.subr.bf16.mxu1 %v2218_v16 }
 0x2b2   : > { %1780 = vmatmul.mubr.f32.gmra.mrb[24].mxu1 %v2487_v2 }
 0x2b3   : > { %1782 = vmatprep.mubr.f32.mxu1 %v2489_v5  ;;  %1996 = vmatpush3.bf16.msra.mxu1 %v1995_v30 }
 0x2b4   : > { %1997 = vmatprep.subr.bf16.mxu1 %v2218_v16 }
 0x2b6   : > { %1783 = vmatmul.mubr.f32.gmra.mrb[26].mxu1 %v2493_v6 }
 0x2b7   : > { %1785 = vmatprep.mubr.f32.mxu1 %v2495_v7  ;;  %1999 = vmatpush3.bf16.msra.mxu1 %v1998_v33 }
 0x2b8   : > { %2000 = vmatprep.subr.bf16.mxu1 %v2218_v16 }
 0x2ba   : > { %1786 = vmatmul.mubr.f32.gmra.mrb[28].mxu1 %v2499_v8 }
 0x2bb   : > { %1788 = vmatprep.mubr.f32.mxu1 %v2501_v9  ;;  %2002 = vmatpush3.bf16.msra.mxu1 %v2001_v36 }
 0x2bc   : > { %2003 = vmatprep.subr.bf16.mxu1 %v2218_v16 }
 0x2be   : > { %1789 = vmatmul.mubr.f32.gmra.mrb[30].mxu1 %v2505_v10 }
 0x2bf   : > { %2005 = vmatpush3.bf16.msra.mxu1 %v2004_v22  ;;  %1879 = vmatprep.mubr.msk.f32.mxu1 %vm2219_vm8, %v2210_v0 }
 0x375   : > { %v1769_v45 = vpop.f32.mrb[16].mxu1 }
 0x376   : > { %v941_v50 = vpop.f32.mrb[17].mxu1 }
 0x377   : > { %1823 = vmatprep.mubr.f32.mxu0 %v941_v50 }
 0x378   : > { %1824 = vmatmul.mubr.f32.vlgmr.msra.gmra.mrb[16].mxu0 %v1769_v45 }
 0x379   : > { %v1772_v53 = vpop.f32.mrb[18].mxu1 }
 0x37a   : > { %v951_v54 = vpop.f32.mrb[19].mxu1 }
 0x37b   : > { %1826 = vmatprep.mubr.f32.mxu0 %v951_v54 }
 0x37c   : > { %1827 = vmatmul.mubr.f32.gmra.mrb[18].mxu0 %v1772_v53 }
 0x37d   : > { %v1775_v57 = vpop.f32.mrb[20].mxu1 }
 0x37e   : > { %v961_v60 = vpop.f32.mrb[21].mxu1 }
 0x37f   : > { %1829 = vmatprep.mubr.f32.mxu0 %v961_v60 }
 0x380   : > { %1830 = vmatmul.mubr.f32.gmra.mrb[20].mxu0 %v1775_v57 }
 0x381   : > { %v1778_v61 = vpop.f32.mrb[22].mxu1 }
 0x382   : > { %v971_v1 = vpop.f32.mrb[23].mxu1 }
 0x383   : > { %1832 = vmatprep.mubr.f32.mxu0 %v971_v1 }
 0x384   : > { %1833 = vmatmul.mubr.f32.gmra.mrb[22].mxu0 %v1778_v61 }
 0x385   : > { %v1781_v2 = vpop.f32.mrb[24].mxu1 }
 0x386   : > { %v981_v5 = vpop.f32.mrb[25].mxu1 }
 0x387   : > { %1835 = vmatprep.mubr.f32.mxu0 %v981_v5 }
 0x388   : > { %1836 = vmatmul.mubr.f32.gmra.mrb[24].mxu0 %v1781_v2 }
 0x389   : > { %v1784_v6 = vpop.f32.mrb[26].mxu1 }
 0x38a   : > { %v991_v7 = vpop.f32.mrb[27].mxu1 }
 0x38b   : > { %1838 = vmatprep.mubr.f32.mxu0 %v991_v7 }
 0x38c   : > { %1839 = vmatmul.mubr.f32.gmra.mrb[26].mxu0 %v1784_v6 }
 0x38d   : > { %v1787_v8 = vpop.f32.mrb[28].mxu1 }
 0x38e   : > { %v1001_v9 = vpop.f32.mrb[29].mxu1 }
 0x38f   : > { %1841 = vmatprep.mubr.f32.mxu0 %v1001_v9 }
 0x390   : > { %1842 = vmatmul.mubr.f32.gmra.mrb[28].mxu0 %v1787_v8 }
 0x391   : > { %v1790_v10 = vpop.f32.mrb[30].mxu1 }
 0x392   : > { %v1011_v28 = vpop.f32.mrb[31].mxu1 }
 0x393   : > { %1844 = vmatprep.mubr.f32.mxu0 %v1011_v28 }
 0x394   : > { %1845 = vmatmul.mubr.f32.gmra.mrb[30].mxu0 %v1790_v10 }
 0x44b   : > { %v1825_v40 = vpop.f32.mrb[16].mxu0 }
 0x44c   : > { %v1115_v41 = vadd.f32 %v1825_v40, %v2565_v39  ;;  %v1109_v42 = vpop.f32.mrb[17].mxu0 }
 0x44d   : > { %v1110_v43 = vadd.f32 %v2565_v39, %v1109_v42 }
 0x44f   : > { %v1188_v44 = vmax.f32 %v1110_v43, %v1115_v41  ;;  %v1828_v46 = vpop.f32.mrb[18].mxu0 }
 0x450   : > { %v1125_v47 = vadd.f32 %v1828_v46, %v2565_v39  ;;  %v1119_v48 = vpop.f32.mrb[19].mxu0 }
 0x451   : > { %v1189_v49 = vrot.slane %v1188_v44, 4  ;;  %v1120_v51 = vadd.f32 %v2565_v39, %v1119_v48 }
 0x453   : > { %v1190_v0 = vmax.f32 %v1188_v44, %v1189_v49  ;;  %v1195_v52 = vmax.f32 %v1120_v51, %v1125_v47  ;;  %v1831_v55 = vpop.f32.mrb[20].mxu0 }
 0x454   : > { %v1135_v56 = vadd.f32 %v1831_v55, %v2565_v39  ;;  %v1129_v58 = vpop.f32.mrb[21].mxu0 }
 0x455   : > { %v1191_v59 = vrot.slane %v1190_v0, 2  ;;  %v1196_v62 = vrot.slane %v1195_v52, 4  ;;  %v1130_v63 = vadd.f32 %v2565_v39, %v1129_v58 }
 0x457   : > { %v1192_v3 = vmax.f32 %v1190_v0, %v1191_v59  ;;  %v1197_v4 = vmax.f32 %v1195_v52, %v1196_v62  ;;  %v1202_v11 = vmax.f32 %v1130_v63, %v1135_v56  ;;  %v1834_v12 = vpop.f32.mrb[22].mxu0 }
 0x458   : > { %v1145_v45 = vadd.f32 %v1834_v12, %v2565_v39  ;;  %v1139_v50 = vpop.f32.mrb[23].mxu0 }
 0x459   : > { %v1198_v53 = vrot.slane %v1197_v4, 2  ;;  %v1203_v54 = vrot.slane %v1202_v11, 4  ;;  %v1140_v57 = vadd.f32 %v2565_v39, %v1139_v50  ;;  %v1193_v60 = vrot.slane %v1192_v3, 1 }
 0x45b   : > { %v1199_v61 = vmax.f32 %v1197_v4, %v1198_v53  ;;  %v1204_v1 = vmax.f32 %v1202_v11, %v1203_v54  ;;  %v1209_v2 = vmax.f32 %v1140_v57, %v1145_v45  ;;  %v1837_v5 = vpop.f32.mrb[24].mxu0  ;;  %v1194_v13 = vmax.f32 %v1192_v3, %v1193_v60 }
 0x45c   : > { %v1155_v6 = vadd.f32 %v1837_v5, %v2565_v39  ;;  %v1149_v7 = vpop.f32.mrb[25].mxu0  ;;  %v1514_v5 = vld [vmem:[%s2640_s7] ss:$0 sm:$0xff] }
 0x45d   : > { %v1200_v8 = vrot.slane %v1199_v61, 1  ;;  %v1205_v9 = vrot.slane %v1204_v1, 2  ;;  %v1210_v10 = vrot.slane %v1209_v2, 4  ;;  %v1150_v28 = vadd.f32 %v2565_v39, %v1149_v7 }
 0x45f   : > { %v1201_v14 = vmax.f32 %v1199_v61, %v1200_v8  ;;  %v1206_v15 = vmax.f32 %v1204_v1, %v1205_v9  ;;  %v1211_v16 = vmax.f32 %v1209_v2, %v1210_v10  ;;  %v1216_v17 = vmax.f32 %v1150_v28, %v1155_v6  ;;  %v1840_v18 = vpop.f32.mrb[26].mxu0 }
 0x460   : > { %v1165_v19 = vadd.f32 %v1840_v18, %v2565_v39  ;;  %v1159_v20 = vpop.f32.mrb[27].mxu0 }
 0x461   : > { %v1276_v21 = vsel %vm1275_vm9, %v1201_v14, %v1194_v13  ;;  %v1207_v23 = vrot.slane %v1206_v15, 1  ;;  %v1212_v24 = vrot.slane %v1211_v16, 2  ;;  %v1217_v25 = vrot.slane %v1216_v17, 4 }
 0x462   : > { %v1160_v26 = vadd.f32 %v2565_v39, %v1159_v20 }
 0x463   : > { %v1208_v27 = vmax.f32 %v1206_v15, %v1207_v23  ;;  %v1213_v29 = vmax.f32 %v1211_v16, %v1212_v24  ;;  %v1218_v30 = vmax.f32 %v1216_v17, %v1217_v25  ;;  %v1843_v31 = vpop.f32.mrb[28].mxu0 }
 0x464   : > { %v1223_v32 = vmax.f32 %v1160_v26, %v1165_v19  ;;  %v1175_v33 = vadd.f32 %v1843_v31, %v2565_v39  ;;  %v1169_v34 = vpop.f32.mrb[29].mxu0 }
 0x465   : > { %v1278_v35 = vsel %vm1277_vm10, %v1208_v27, %v1276_v21  ;;  %v1214_v36 = vrot.slane %v1213_v29, 1  ;;  %v1219_v37 = vrot.slane %v1218_v30, 2  ;;  %v1170_v38 = vadd.f32 %v2565_v39, %v1169_v34 }
 0x466   : > { %v1224_v22 = vrot.slane %v1223_v32, 4 }
 0x467   : > { %v1215_v40 = vmax.f32 %v1213_v29, %v1214_v36  ;;  %v1220_v41 = vmax.f32 %v1218_v30, %v1219_v37  ;;  %v1230_v42 = vmax.f32 %v1170_v38, %v1175_v33  ;;  %v1846_v43 = vpop.f32.mrb[30].mxu0 }
 0x468   : > { %v1225_v44 = vmax.f32 %v1223_v32, %v1224_v22  ;;  %v1185_v46 = vadd.f32 %v1846_v43, %v2565_v39  ;;  %v1179_v47 = vpop.f32.mrb[31].mxu0 }
 0x469   : > { %v1280_v48 = vsel %vm1279_vm11, %v1215_v40, %v1278_v35  ;;  %v1221_v49 = vrot.slane %v1220_v41, 1  ;;  %v1231_v51 = vrot.slane %v1230_v42, 4  ;;  %v1180_v0 = vadd.f32 %v2565_v39, %v1179_v47 }
 0x46a   : > { %v1226_v52 = vrot.slane %v1225_v44, 2 }
 0x46b   : > { %v1222_v55 = vmax.f32 %v1220_v41, %v1221_v49  ;;  %v1232_v56 = vmax.f32 %v1230_v42, %v1231_v51  ;;  %v1237_v58 = vmax.f32 %v1180_v0, %v1185_v46 }
 0x46c   : > { %v1227_v59 = vmax.f32 %v1225_v44, %v1226_v52 }
 0x46d   : > { %v1233_v62 = vrot.slane %v1232_v56, 2  ;;  %v1238_v63 = vrot.slane %v1237_v58, 4  ;;  %v1282_v3 = vsel %vm1281_vm12, %v1222_v55, %v1280_v48 }
 0x46e   : > { %v1228_v4 = vrot.slane %v1227_v59, 1 }
 0x46f   : > { %v1234_v11 = vmax.f32 %v1232_v56, %v1233_v62  ;;  %v1239_v12 = vmax.f32 %v1237_v58, %v1238_v63 }
 0x470   : > { %v1229_v45 = vmax.f32 %v1227_v59, %v1228_v4 }
 0x471   : > { %v1235_v50 = vrot.slane %v1234_v11, 1  ;;  %v1240_v53 = vrot.slane %v1239_v12, 2 }
 0x472   : > { %v1284_v54 = vsel %vm1283_vm13, %v1229_v45, %v1282_v3 }
 0x473   : > { %v1236_v39 = vmax.f32 %v1234_v11, %v1235_v50  ;;  %v1241_v57 = vmax.f32 %v1239_v12, %v1240_v53 }
 0x475   : > { %v1242_v60 = vrot.slane %v1241_v57, 1  ;;  %v1286_v61 = vsel %vm1285_vm14, %v1236_v39, %v1284_v54 }
 0x477   : > { %v1243_v1 = vmax.f32 %v1241_v57, %v1242_v60 }
 0x479   : > { %v1288_v2 = vsel %vm1287_vm15, %v1243_v1, %v1286_v61 }
 0x47a   : > { %1880 = vmatmul.mubr.f32.vlgmr.msra.gmra.mrb[32].mxu1 %v1288_v2 }
 0x54d   : > { %v1356_v6 = vpop.f32.mrb[32].mxu1 }
 0x54e   : > { %v1357_v7 = vadd.f32 %v1514_v5, %v1356_v6  ;;  %v1881_v8 = vpop.f32.mrb[33].mxu1 }
 0x550   : > { %1360 = vst [vmem:[%s347_s24] sm:$0xff] %v1357_v7 }
 0x551   : > { %2147 = shalt.err (!%p2144_p13)
}
 0x552   : > { %s2148_s13 = scalar_lea.hbm %s2591_s25, 128  ;;  %s2152_s29 = scalar_lea.hbm %s2641_s8, 256 }
 0x553   : > { %p2149_p5 = scmp.ne.s32.totalorder %s2591_s25, %s2148_s13  ;;  %p2153_p9 = scmp.lt.u32.totalorder %s2591_s25, %s2641_s8 }
 0x554   : > { %p2154_p10 = scmp.lt.u32.totalorder %s2152_s29, %s2148_s13  ;;  %p2156_p1 = scmp.lt.u32.totalorder %s2148_s13, %s2591_s25 }
 0x555   : > { %p2150_p0 = pnand %p2149_p5, %p2658_p2 }
 0x556   : > { %p2155_p12 = por %p2154_p10, %p2153_p9 }
 0x557   : > { %p2151_p6 = pneg %p2150_p0 }
 0x558   : > { %p2157_p3 = por %p2156_p1, %p2155_p12 }
 0x55a   : > { %p2158_p4 = pnand %p2157_p3, %p2151_p6 }
 0x55c   : > { %2161 = shalt.err (!%p2158_p4)
}
 0x55d   : > { %2014 = dma.vmem_to_hbm [thread:$0]  (%p2658_p2), %s2593_s17, 128, %s2591_s25, %s1362_s26  }
 0x55e PF: > { %p2031_p7 = scmp.ge.s32.totalorder %s2204_s30, 2  ;;  %s1387_s24 = sand.u32 1, %s2192_s27  }
 0x55f   : > { %p2659_p8 = scmp.ne.s32.totalorder %s2649_s16, 0  ;;  %s1388_s22 = scalar_lea.sflag [#allocation5], %s1387_s24 }
 0x561   : > { %p2024_p11 = pnand %p2031_p7, %p2659_p8 }
 0x563   : > { %2187 = dma.done.wait (!%p2024_p11), %s1388_s22, 128  }
 0x564   : > { %2189 = vsyncadd (!%p2024_p11), %s1388_s22, 4294967168  ;;  %s2660_s21 = sld [smem:[#allocation12_spill]]  ;;  %s2661_s29 = sld [smem:[#allocation13_spill]] }
 0x565   : > { %p20_p13 = scmp.ge.s32.totalorder %s2291_s11, 4   ;;  %s2662_s27 = smov %s2196_s28 }
 0x566   : > { %s2664_s30 = smov %s2291_s11 }
 0x567   :  { %22 = sbr.rel (!%p20_p13) target bundleno = 5 (0x5), region = 106 }
 0x56a   : > { %s2663_s28 = smov %s2660_s21 }
 0x56e   :  { %1393 = vsyncpa [#allocation4], 1 }
 0x56f   :  { %1395 = vsyncpa [#allocation4 + $0x1], 1 }
 0x570   :  { %1396 = vsyncpa [#allocation7], 1 }
 0x571   :  { %1397 = vsyncpa [#allocation5], 1 }
 0x572   :  { %1399 = vsyncpa [#allocation5 + $0x1], 1 }

</bundles_post_ra>
